<compile_context>
chip_gen: v5e
topology: v5e:2x2
jax: 0.10.0
libtpu: 0.0.40
codegen_flags: <defaults>
</compile_context>

<pallas_src>
import functools

import jax
import jax.numpy as jnp
from jax.experimental import pallas as pl
from jax.experimental.pallas import tpu as pltpu


def _round_up(n, m):
    return ((n + m - 1) // m) * m


def _elu(v):
    # F.elu with alpha=1: x if x > 0 else exp(x) - 1
    return jnp.where(v > 0, v, jnp.exp(jnp.minimum(v, 0.0)) - 1.0)


def xvae_kernel(
    x_ref, eps_ref,
    w_enc_ref, w_mulv_ref, w_dec1_ref, w_dec2_ref,
    consts_ref,
    out_ref,
):
    f32 = jnp.float32
    x = x_ref[...]
    eps = eps_ref[...].astype(f32)
    H2 = eps.shape[-1]
    H1 = w_enc_ref.shape[-1]
    W_out = out_ref.shape[-1]

    # Consolidated (1, n) constants: prefix lane slices (cheap, static).
    b_enc = consts_ref[0:1, :H1]
    bn1_s = consts_ref[1:2, :H1]
    bn1_b = consts_ref[2:3, :H1]
    bn2_s = consts_ref[3:4, :H2]
    bn2_b = consts_ref[4:5, :H2]
    b_dec1 = consts_ref[5:6, :H1]
    b_mulv = consts_ref[6:7, :W_out]   # padded to the output slab width
    b_dec2 = consts_ref[7:8, :W_out]
    relu_m = consts_ref[8:9, :W_out]

    def mm(a, w_ref):
        w = w_ref[...]
        return jnp.dot(a.astype(w.dtype), w, preferred_element_type=f32)

    # ---------------- encode ----------------
    # block-diagonal fc11/fc12 -> one wide matmul; ELU then folded BN11|BN12
    h1 = _elu(mm(x, w_enc_ref) + b_enc)
    h1 = h1 * bn1_s + bn1_b                       # dropout = identity (eval)

    # fc21|fc22 fused; weights pre-padded so mu|logvar land at lanes [0:2*H2]
    ml = mm(h1, w_mulv_ref) + b_mulv              # (tile_b, W_out), zeros elsewhere
    mu = ml[:, :H2]
    logvar = ml[:, H2:2 * H2]

    # ---------------- reparameterize ----------------
    z = mu + eps * jnp.exp(0.5 * logvar)

    # ---------------- decode ----------------
    zb = z * bn2_s + bn2_b                        # bn2 (eval); dropout = identity
    h3 = _elu(mm(zb, w_dec1_ref) + b_dec1)        # fc31|fc32 fused
    h3 = h3 * bn1_s + bn1_b                       # bn11|bn12 folded
    # block-diag fc41/fc42, pre-padded to land at lanes [2*H2 : 2*H2 + D1 + D2]
    h4 = mm(h3, w_dec2_ref) + b_dec2              # (tile_b, W_out), zeros elsewhere
    rec = jnp.where(relu_m > 0.5, jnp.maximum(h4, 0.0), h4)

    # rec and ml occupy disjoint lanes (zeros elsewhere): one dense 128-lane store.
    out_ref[...] = (rec + ml).astype(out_ref.dtype)


def init_params(key, D1, D2, H11, H12, H2):
    ks = jax.random.split(key, 8)

    def lin(k, din, dout):
        kw, kb = jax.random.split(k)
        w = jax.random.normal(kw, (din, dout), jnp.float32) / jnp.sqrt(float(din))
        b = jax.random.normal(kb, (1, dout), jnp.float32) * 0.01
        return w, b

    w11, b11 = lin(ks[0], D1, H11)
    w12, b12 = lin(ks[1], D2, H12)
    w21, b21 = lin(ks[2], H11 + H12, H2)
    w22, b22 = lin(ks[3], H11 + H12, H2)
    w31, b31 = lin(ks[4], H2, H11)
    w32, b32 = lin(ks[5], H2, H12)
    w41, b41 = lin(ks[6], H11, D1)
    w42, b42 = lin(ks[7], H12, D2)

    def bn(dim, eps=1e-5):
        gamma = jnp.ones((1, dim), jnp.float32)
        beta = jnp.zeros((1, dim), jnp.float32)
        rmean = jnp.zeros((1, dim), jnp.float32)
        rvar = jnp.ones((1, dim), jnp.float32)
        scale = gamma / jnp.sqrt(rvar + eps)
        shift = beta - rmean * scale
        return scale, shift

    bn11_s, bn11_b = bn(H11)
    bn12_s, bn12_b = bn(H12)
    bn2_s, bn2_b = bn(H2)

    return dict(
        w11=w11, b11=b11, w12=w12, b12=b12,
        w21=w21, b21=b21, w22=w22, b22=b22,
        w31=w31, b31=b31, w32=w32, b32=b32,
        w41=w41, b41=b41, w42=w42, b42=b42,
        bn11_s=bn11_s, bn11_b=bn11_b,
        bn12_s=bn12_s, bn12_b=bn12_b,
        bn2_s=bn2_s, bn2_b=bn2_b,
    )


def fuse_params(p, D1, D2, H11, H12, H2, io_dtype=jnp.float32):
    """Fold the 8 linears into 4 kernel weights (pre-padded to the output slab
    layout) and pack all (1, n) vectors into one lane-padded constants block."""
    f32 = jnp.float32
    H1 = H11 + H12
    Din = D1 + D2
    W_out = _round_up(2 * H2 + Din, 128)
    Wc = _round_up(max(H1, H2, W_out), 128)
    off = 2 * H2  # recon starts after mu|logvar in the output slab

    # encoder: block-diag [w11 0; 0 w12] -> (D1+D2, H11+H12)
    w_enc = jnp.zeros((Din, H1), f32)
    w_enc = w_enc.at[:D1, :H11].set(p["w11"]).at[D1:, H11:].set(p["w12"])
    b_enc = jnp.concatenate([p["b11"], p["b12"]], axis=1)
    bn1_s = jnp.concatenate([p["bn11_s"], p["bn12_s"]], axis=1)
    bn1_b = jnp.concatenate([p["bn11_b"], p["bn12_b"]], axis=1)

    # mu|logvar: (H1, W_out), real columns at [0 : 2*H2]
    w_mulv = jnp.zeros((H1, W_out), f32)
    w_mulv = w_mulv.at[:, :H2].set(p["w21"]).at[:, H2:2 * H2].set(p["w22"])
    b_mulv = jnp.zeros((1, W_out), f32)
    b_mulv = b_mulv.at[:, :H2].set(p["b21"]).at[:, H2:2 * H2].set(p["b22"])

    # decoder stage 1: fc31|fc32 -> (H2, H1)
    w_dec1 = jnp.concatenate([p["w31"], p["w32"]], axis=1)
    b_dec1 = jnp.concatenate([p["b31"], p["b32"]], axis=1)

    # decoder stage 2: block-diag fc41/fc42, real columns at [off : off + Din]
    w_dec2 = jnp.zeros((H1, W_out), f32)
    w_dec2 = w_dec2.at[:H11, off:off + D1].set(p["w41"])
    w_dec2 = w_dec2.at[H11:, off + D1:off + Din].set(p["w42"])
    b_dec2 = jnp.zeros((1, W_out), f32)
    b_dec2 = b_dec2.at[:, off:off + D1].set(p["b41"])
    b_dec2 = b_dec2.at[:, off + D1:off + Din].set(p["b42"])
    relu_m = jnp.zeros((1, W_out), f32).at[:, off:off + D1].set(1.0)

    # consolidate all (1, n) vectors into one constants block (kept f32)
    consts = jnp.zeros((9, Wc), f32)
    consts = consts.at[0, :H1].set(b_enc[0])
    consts = consts.at[1, :H1].set(bn1_s[0])
    consts = consts.at[2, :H1].set(bn1_b[0])
    consts = consts.at[3, :H2].set(p["bn2_s"][0])
    consts = consts.at[4, :H2].set(p["bn2_b"][0])
    consts = consts.at[5, :H1].set(b_dec1[0])
    consts = consts.at[6, :W_out].set(b_mulv[0])
    consts = consts.at[7, :W_out].set(b_dec2[0])
    consts = consts.at[8, :W_out].set(relu_m[0])

    return dict(
        w_enc=w_enc.astype(io_dtype),
        w_mulv=w_mulv.astype(io_dtype),
        w_dec1=w_dec1.astype(io_dtype),
        w_dec2=w_dec2.astype(io_dtype),
        consts=consts,
    )


def _pick_tile_b(B):
    """Batch tile: single step on 1-TC chips (v5e/v6e), >=2 steps on v7x."""
    def largest_divisor_tile(cap):
        cap = min(cap, B)
        t = cap - (cap % 8)
        while t >= 8:
            if B % t == 0:
                return t
            t -= 8
        return B  # fallback: one full-batch tile (block == full array dim)

    try:
        kind = jax.devices()[0].device_kind.lower()
    except Exception:
        kind = ""
    multicore = ("v7" in kind) or ("tpu7" in kind)
    if multicore and B >= 16:
        # keep both TensorCores busy, but respect v7x's 64 MiB physical VMEM
        return largest_divisor_tile(min(2048, B // 2))
    # v5e / v6e: one TensorCore -> fewer, bigger grid steps
    return largest_divisor_tile(4096)


_WEIGHT_ORDER = ("w_enc", "w_mulv", "w_dec1", "w_dec2")


@functools.partial(jax.jit, static_argnames=("tile_b",))
def xvae_forward(x, eps, fused, *, tile_b=None):
    B, Din = x.shape          # Din = D1 + D2
    H2 = eps.shape[1]
    W_out = fused["w_mulv"].shape[1]

    if tile_b is None:
        tile_b = _pick_tile_b(B)
    assert B % tile_b == 0
    assert tile_b % 8 == 0 or tile_b == B

    weights = [fused[name] for name in _WEIGHT_ORDER]
    consts = fused["consts"]

    def row_spec(nfeat):
        # tile over batch, full feature width on the lane axis
        return pl.BlockSpec((tile_b, nfeat), lambda i: (i, 0))

    def full_spec(arr):
        return pl.BlockSpec(arr.shape, lambda i: (0, 0))

    in_specs = ([row_spec(Din), row_spec(H2)]
                + [full_spec(w) for w in weights]
                + [full_spec(consts)])

    out = pl.pallas_call(
        xvae_kernel,
        out_shape=jax.ShapeDtypeStruct((B, W_out), x.dtype),
        grid_spec=pltpu.PrefetchScalarGridSpec(
            num_scalar_prefetch=0,
            grid=(B // tile_b,),
            in_specs=in_specs,
            out_specs=row_spec(W_out),
        ),
        compiler_params=pltpu.CompilerParams(
            dimension_semantics=("parallel",),
            vmem_limit_bytes=32 * 1024 * 1024,
        ),
    )(x, eps, *weights, consts)

    mu = out[:, :H2]
    logvar = out[:, H2:2 * H2]
    recon = out[:, 2 * H2:2 * H2 + Din]
    return recon, mu, logvar


def xvae_reference(x, eps, p, D1):
    """Pure-JAX reference mirroring the PyTorch forward (eval mode)."""
    x1 = x[:, :D1]
    x2 = x[:, D1:]
    h11 = _elu(x1 @ p["w11"] + p["b11"]) * p["bn11_s"] + p["bn11_b"]
    h12 = _elu(x2 @ p["w12"] + p["b12"]) * p["bn12_s"] + p["bn12_b"]
    h1 = jnp.concatenate([h11, h12], axis=1)
    mu = h1 @ p["w21"] + p["b21"]
    logvar = h1 @ p["w22"] + p["b22"]
    z = mu + eps * jnp.exp(0.5 * logvar)
    zb = z * p["bn2_s"] + p["bn2_b"]
    h31 = _elu(zb @ p["w31"] + p["b31"])
    h32 = _elu(zb @ p["w32"] + p["b32"])
    h41 = jnp.maximum((h31 * p["bn11_s"] + p["bn11_b"]) @ p["w41"] + p["b41"], 0.0)
    h42 = (h32 * p["bn12_s"] + p["bn12_b"]) @ p["w42"] + p["b42"]
    return jnp.concatenate([h41, h42], axis=1), mu, logvar


if __name__ == "__main__":
    # Small, module-consistent sizes
    B, D1, D2, H11, H12, H2 = 32, 16, 24, 32, 16, 8

    key = jax.random.PRNGKey(0)
    k_x, k_eps, k_p = jax.random.split(key, 3)

    x = jax.random.normal(k_x, (B, D1 + D2), jnp.float32)
    eps = jax.random.normal(k_eps, (B, H2), jnp.float32)  # randn_like(std), fixed
    params = init_params(k_p, D1, D2, H11, H12, H2)
    # f32 I/O for the strict correctness check; pass io_dtype=jnp.bfloat16 for
    # HBM-bound large-batch runs (relax tolerances to ~1e-2 in that case).
    fused = fuse_params(params, D1, D2, H11, H12, H2)

    recon, mu, logvar = xvae_forward(x, eps, fused)
    jax.block_until_ready((recon, mu, logvar))

    # Correctness check against the plain-JAX reference
    r_ref, mu_ref, lv_ref = xvae_reference(x, eps, params, D1)
    assert recon.shape == (B, D1 + D2) and mu.shape == (B, H2) and logvar.shape == (B, H2)
    assert jnp.allclose(recon, r_ref, atol=2e-3, rtol=2e-3)
    assert jnp.allclose(mu, mu_ref, atol=2e-3, rtol=2e-3)
    assert jnp.allclose(logvar, lv_ref, atol=2e-3, rtol=2e-3)

    print("KERNEL_OK")
</pallas_src>

<mosaic_0001>
module attributes {stable_mosaic.version = 11 : i64} {
  func.func @xvae_kernel(%arg0: i32, %arg1: memref<32x40xf32, #tpu.memory_space<vmem>>, %arg2: memref<32x8xf32, #tpu.memory_space<vmem>>, %arg3: memref<40x48xf32, #tpu.memory_space<vmem>>, %arg4: memref<48x128xf32, #tpu.memory_space<vmem>>, %arg5: memref<8x48xf32, #tpu.memory_space<vmem>>, %arg6: memref<48x128xf32, #tpu.memory_space<vmem>>, %arg7: memref<9x128xf32, #tpu.memory_space<vmem>>, %arg8: memref<32x128xf32, #tpu.memory_space<vmem>>) attributes {dimension_semantics = [#tpu.dimension_semantics<parallel>], iteration_bounds = array<i64: 1>, scalar_prefetch = 0 : i64, scratch_operands = 0 : i64, tpu.core_type = #tpu.core_type<tc>, window_params = [{transform_indices = @transform_0, window_bounds = array<i64: 32, 40>}, {transform_indices = @transform_1, window_bounds = array<i64: 32, 8>}, {pipeline_mode = #tpu.pipeline_mode<synchronous>, transform_indices = @transform_2, window_bounds = array<i64: 40, 48>}, {pipeline_mode = #tpu.pipeline_mode<synchronous>, transform_indices = @transform_3, window_bounds = array<i64: 48, 128>}, {pipeline_mode = #tpu.pipeline_mode<synchronous>, transform_indices = @transform_4, window_bounds = array<i64: 8, 48>}, {pipeline_mode = #tpu.pipeline_mode<synchronous>, transform_indices = @transform_5, window_bounds = array<i64: 48, 128>}, {pipeline_mode = #tpu.pipeline_mode<synchronous>, transform_indices = @transform_6, window_bounds = array<i64: 9, 128>}, {transform_indices = @transform_7, window_bounds = array<i64: 32, 128>}]} {
    %c0 = arith.constant 0 : index
    %c0_0 = arith.constant 0 : index
    %0 = vector.load %arg1[%c0, %c0_0] : memref<32x40xf32, #tpu.memory_space<vmem>>, vector<32x40xf32>
    %c0_1 = arith.constant 0 : index
    %c0_2 = arith.constant 0 : index
    %1 = vector.load %arg2[%c0_1, %c0_2] : memref<32x8xf32, #tpu.memory_space<vmem>>, vector<32x8xf32>
    %c0_3 = arith.constant 0 : index
    %c0_4 = arith.constant 0 : index
    %2 = vector.load %arg7[%c0_3, %c0_4] : memref<9x128xf32, #tpu.memory_space<vmem>>, vector<1x48xf32>
    %c1 = arith.constant 1 : index
    %c0_5 = arith.constant 0 : index
    %3 = vector.load %arg7[%c1, %c0_5] : memref<9x128xf32, #tpu.memory_space<vmem>>, vector<1x48xf32>
    %c2 = arith.constant 2 : index
    %c0_6 = arith.constant 0 : index
    %4 = vector.load %arg7[%c2, %c0_6] : memref<9x128xf32, #tpu.memory_space<vmem>>, vector<1x48xf32>
    %c3 = arith.constant 3 : index
    %c0_7 = arith.constant 0 : index
    %5 = vector.load %arg7[%c3, %c0_7] : memref<9x128xf32, #tpu.memory_space<vmem>>, vector<1x8xf32>
    %c4 = arith.constant 4 : index
    %c0_8 = arith.constant 0 : index
    %6 = vector.load %arg7[%c4, %c0_8] : memref<9x128xf32, #tpu.memory_space<vmem>>, vector<1x8xf32>
    %c5 = arith.constant 5 : index
    %c0_9 = arith.constant 0 : index
    %7 = vector.load %arg7[%c5, %c0_9] : memref<9x128xf32, #tpu.memory_space<vmem>>, vector<1x48xf32>
    %c6 = arith.constant 6 : index
    %c0_10 = arith.constant 0 : index
    %8 = vector.load %arg7[%c6, %c0_10] : memref<9x128xf32, #tpu.memory_space<vmem>>, vector<1x128xf32>
    %c7 = arith.constant 7 : index
    %c0_11 = arith.constant 0 : index
    %9 = vector.load %arg7[%c7, %c0_11] : memref<9x128xf32, #tpu.memory_space<vmem>>, vector<1x128xf32>
    %c8 = arith.constant 8 : index
    %c0_12 = arith.constant 0 : index
    %10 = vector.load %arg7[%c8, %c0_12] : memref<9x128xf32, #tpu.memory_space<vmem>>, vector<1x128xf32>
    %c0_13 = arith.constant 0 : index
    %c0_14 = arith.constant 0 : index
    %11 = vector.load %arg3[%c0_13, %c0_14] : memref<40x48xf32, #tpu.memory_space<vmem>>, vector<40x48xf32>
    %cst = arith.constant dense<0.000000e+00> : vector<32x48xf32>
    %12 = tpu.matmul %0, %11, %cst {dimension_numbers = #tpu.dot_dimension_numbers<[1], [0], [0], [1], [0, 0, 1, 1], [], []>} : vector<32x40xf32>, vector<40x48xf32>, vector<32x48xf32> -> vector<32x48xf32>
    %13 = vector.broadcast %2 : vector<1x48xf32> to vector<32x48xf32>
    %14 = arith.addf %12, %13 : vector<32x48xf32>
    %cst_15 = arith.constant 0.000000e+00 : f32
    %15 = vector.broadcast %cst_15 : f32 to vector<32x48xf32>
    %16 = arith.cmpf ogt, %14, %15 : vector<32x48xf32>
    %cst_16 = arith.constant 0.000000e+00 : f32
    %17 = vector.broadcast %cst_16 : f32 to vector<32x48xf32>
    %18 = arith.minimumf %14, %17 : vector<32x48xf32>
    %19 = math.exp %18 : vector<32x48xf32>
    %cst_17 = arith.constant 1.000000e+00 : f32
    %20 = vector.broadcast %cst_17 : f32 to vector<32x48xf32>
    %21 = arith.subf %19, %20 : vector<32x48xf32>
    %22 = arith.select %16, %14, %21 : vector<32x48xi1>, vector<32x48xf32>
    %23 = vector.broadcast %3 : vector<1x48xf32> to vector<32x48xf32>
    %24 = arith.mulf %22, %23 : vector<32x48xf32>
    %25 = vector.broadcast %4 : vector<1x48xf32> to vector<32x48xf32>
    %26 = arith.addf %24, %25 : vector<32x48xf32>
    %c0_18 = arith.constant 0 : index
    %c0_19 = arith.constant 0 : index
    %27 = vector.load %arg4[%c0_18, %c0_19] : memref<48x128xf32, #tpu.memory_space<vmem>>, vector<48x128xf32>
    %cst_20 = arith.constant dense<0.000000e+00> : vector<32x128xf32>
    %28 = tpu.matmul %26, %27, %cst_20 {dimension_numbers = #tpu.dot_dimension_numbers<[1], [0], [0], [1], [0, 0, 1, 1], [], []>} : vector<32x48xf32>, vector<48x128xf32>, vector<32x128xf32> -> vector<32x128xf32>
    %29 = vector.broadcast %8 : vector<1x128xf32> to vector<32x128xf32>
    %30 = arith.addf %28, %29 : vector<32x128xf32>
    %31 = vector.extract_strided_slice %30 {offsets = [0, 0], sizes = [32, 8], strides = [1, 1]} : vector<32x128xf32> to vector<32x8xf32>
    %32 = vector.extract_strided_slice %30 {offsets = [0, 8], sizes = [32, 8], strides = [1, 1]} : vector<32x128xf32> to vector<32x8xf32>
    %cst_21 = arith.constant 5.000000e-01 : f32
    %33 = vector.broadcast %cst_21 : f32 to vector<32x8xf32>
    %34 = arith.mulf %33, %32 : vector<32x8xf32>
    %35 = math.exp %34 : vector<32x8xf32>
    %36 = arith.mulf %1, %35 : vector<32x8xf32>
    %37 = arith.addf %31, %36 : vector<32x8xf32>
    %38 = vector.broadcast %5 : vector<1x8xf32> to vector<32x8xf32>
    %39 = arith.mulf %37, %38 : vector<32x8xf32>
    %40 = vector.broadcast %6 : vector<1x8xf32> to vector<32x8xf32>
    %41 = arith.addf %39, %40 : vector<32x8xf32>
    %c0_22 = arith.constant 0 : index
    %c0_23 = arith.constant 0 : index
    %42 = vector.load %arg5[%c0_22, %c0_23] : memref<8x48xf32, #tpu.memory_space<vmem>>, vector<8x48xf32>
    %cst_24 = arith.constant dense<0.000000e+00> : vector<32x48xf32>
    %43 = tpu.matmul %41, %42, %cst_24 {dimension_numbers = #tpu.dot_dimension_numbers<[1], [0], [0], [1], [0, 0, 1, 1], [], []>} : vector<32x8xf32>, vector<8x48xf32>, vector<32x48xf32> -> vector<32x48xf32>
    %44 = vector.broadcast %7 : vector<1x48xf32> to vector<32x48xf32>
    %45 = arith.addf %43, %44 : vector<32x48xf32>
    %cst_25 = arith.constant 0.000000e+00 : f32
    %46 = vector.broadcast %cst_25 : f32 to vector<32x48xf32>
    %47 = arith.cmpf ogt, %45, %46 : vector<32x48xf32>
    %cst_26 = arith.constant 0.000000e+00 : f32
    %48 = vector.broadcast %cst_26 : f32 to vector<32x48xf32>
    %49 = arith.minimumf %45, %48 : vector<32x48xf32>
    %50 = math.exp %49 : vector<32x48xf32>
    %cst_27 = arith.constant 1.000000e+00 : f32
    %51 = vector.broadcast %cst_27 : f32 to vector<32x48xf32>
    %52 = arith.subf %50, %51 : vector<32x48xf32>
    %53 = arith.select %47, %45, %52 : vector<32x48xi1>, vector<32x48xf32>
    %54 = vector.broadcast %3 : vector<1x48xf32> to vector<32x48xf32>
    %55 = arith.mulf %53, %54 : vector<32x48xf32>
    %56 = vector.broadcast %4 : vector<1x48xf32> to vector<32x48xf32>
    %57 = arith.addf %55, %56 : vector<32x48xf32>
    %c0_28 = arith.constant 0 : index
    %c0_29 = arith.constant 0 : index
    %58 = vector.load %arg6[%c0_28, %c0_29] : memref<48x128xf32, #tpu.memory_space<vmem>>, vector<48x128xf32>
    %cst_30 = arith.constant dense<0.000000e+00> : vector<32x128xf32>
    %59 = tpu.matmul %57, %58, %cst_30 {dimension_numbers = #tpu.dot_dimension_numbers<[1], [0], [0], [1], [0, 0, 1, 1], [], []>} : vector<32x48xf32>, vector<48x128xf32>, vector<32x128xf32> -> vector<32x128xf32>
    %60 = vector.broadcast %9 : vector<1x128xf32> to vector<32x128xf32>
    %61 = arith.addf %59, %60 : vector<32x128xf32>
    %cst_31 = arith.constant 5.000000e-01 : f32
    %62 = vector.broadcast %cst_31 : f32 to vector<1x128xf32>
    %63 = arith.cmpf ogt, %10, %62 : vector<1x128xf32>
    %cst_32 = arith.constant 0.000000e+00 : f32
    %64 = vector.broadcast %cst_32 : f32 to vector<32x128xf32>
    %65 = arith.maximumf %61, %64 : vector<32x128xf32>
    %66 = vector.shape_cast %63 : vector<1x128xi1> to vector<1x128xi1>
    %67 = vector.broadcast %66 : vector<1x128xi1> to vector<32x128xi1>
    %68 = arith.select %67, %65, %61 : vector<32x128xi1>, vector<32x128xf32>
    %69 = arith.addf %68, %30 : vector<32x128xf32>
    %c0_33 = arith.constant 0 : index
    %c0_34 = arith.constant 0 : index
    %70 = vector.load %arg8[%c0_33, %c0_34] : memref<32x128xf32, #tpu.memory_space<vmem>>, vector<32x128xf32>
    tpu.vector_store %arg8[%c0_33, %c0_34], %69 {strides = array<i32>} : memref<32x128xf32, #tpu.memory_space<vmem>>, vector<32x128xf32>,
    return
  }
  func.func @transform_0(%arg0: i32) -> (i32, i32) {
    %c0_i32 = arith.constant 0 : i32
    %c0_i32_0 = arith.constant 0 : i32
    return %arg0, %c0_i32 : i32, i32
  }
  func.func @transform_1(%arg0: i32) -> (i32, i32) {
    %c0_i32 = arith.constant 0 : i32
    %c0_i32_0 = arith.constant 0 : i32
    return %arg0, %c0_i32 : i32, i32
  }
  func.func @transform_2(%arg0: i32) -> (i32, i32) {
    %c0_i32 = arith.constant 0 : i32
    %c0_i32_0 = arith.constant 0 : i32
    %c0_i32_1 = arith.constant 0 : i32
    return %c0_i32, %c0_i32_0 : i32, i32
  }
  func.func @transform_3(%arg0: i32) -> (i32, i32) {
    %c0_i32 = arith.constant 0 : i32
    %c0_i32_0 = arith.constant 0 : i32
    %c0_i32_1 = arith.constant 0 : i32
    return %c0_i32, %c0_i32_0 : i32, i32
  }
  func.func @transform_4(%arg0: i32) -> (i32, i32) {
    %c0_i32 = arith.constant 0 : i32
    %c0_i32_0 = arith.constant 0 : i32
    %c0_i32_1 = arith.constant 0 : i32
    return %c0_i32, %c0_i32_0 : i32, i32
  }
  func.func @transform_5(%arg0: i32) -> (i32, i32) {
    %c0_i32 = arith.constant 0 : i32
    %c0_i32_0 = arith.constant 0 : i32
    %c0_i32_1 = arith.constant 0 : i32
    return %c0_i32, %c0_i32_0 : i32, i32
  }
  func.func @transform_6(%arg0: i32) -> (i32, i32) {
    %c0_i32 = arith.constant 0 : i32
    %c0_i32_0 = arith.constant 0 : i32
    %c0_i32_1 = arith.constant 0 : i32
    return %c0_i32, %c0_i32_0 : i32, i32
  }
  func.func @transform_7(%arg0: i32) -> (i32, i32) {
    %c0_i32 = arith.constant 0 : i32
    %c0_i32_0 = arith.constant 0 : i32
    return %arg0, %c0_i32 : i32, i32
  }
}

</mosaic_0001>

<bundles_post_ra>
// kernel: xvae_forward.1
= control target key start
LH: loop header
LB: loop body
LE: loop exit
PB: predicated region body
PF: predicated region fallthrough
CT: control target
= control target key end

     0   :  { %12 = vsyncpa [#allocation3], 0  ;;  %s805_s0 = inlined_call_operand.hbm [shape: f32[32,40], index: 0, kind: input, shape index: {}]   ;;  %s806_s1 = inlined_call_operand.vmem [shape: f32[32,8], index: 1, kind: input, shape index: {}]   ;;  %s807_s2 = inlined_call_operand.vmem [shape: f32[40,48], index: 2, kind: input, shape index: {}]   ;;  %s808_s3 = inlined_call_operand.hbm [shape: f32[48,128], index: 3, kind: input, shape index: {}]   ;;  %s809_s4 = inlined_call_operand.hbm [shape: f32[8,48], index: 4, kind: input, shape index: {}]   ;;  %s810_s5 = inlined_call_operand.hbm [shape: f32[48,128], index: 5, kind: input, shape index: {}]   ;;  %s811_s6 = inlined_call_operand.hbm [shape: f32[9,128], index: 6, kind: input, shape index: {}]   ;;  %s812_s7 = inlined_call_operand.vmem [shape: f32[32,128], index: 7, kind: output, shape index: {}]  }
   0x1   :  { %13 = vsyncpa [#allocation5], 0 }
   0x2   :  { %14 = vsyncpa [#allocation8], 0  ;;  %s36_s26 = sshll.u32 %s808_s3, 4  ;;  %s638_s27 = smov [#allocation4]   ;;  %s37_s26 = int_to_ptr.hbm [resolvable:$true] %s36_s26 }
   0x3   :  { %s38_s28 = sshll.u32 %s638_s27, 4  ;;  %s60_s8 = sshll.u32 %s810_s5, 4  ;;  %s39_s28 = int_to_ptr.vmem [resolvable:$true] %s38_s28  ;;  %s61_s8 = int_to_ptr.hbm [resolvable:$true] %s60_s8 }
   0x4   :  { %s639_s9 = smov 128   ;;  %s640_s10 = smov 8  }
   0x5   :  { %44 = dma.hbm_to_vmem [thread:$0]  %s37_s26, 768, %s39_s28, [#allocation5], %s639_s9, %s639_s9, %s640_s10  }
   0x6   :  { %s641_s11 = smov [#allocation7]   ;;  %s19_s15 = sshll.u32 %s805_s0, 4  ;;  %s20_s15 = int_to_ptr.hbm [resolvable:$true] %s19_s15 }
   0x7   :  { %s62_s12 = sshll.u32 %s641_s11, 4  ;;  %s50_s17 = sshll.u32 %s809_s4, 4  ;;  %s63_s12 = int_to_ptr.vmem [resolvable:$true] %s62_s12  ;;  %s51_s17 = int_to_ptr.hbm [resolvable:$true] %s50_s17 }
   0x8   :  { %68 = dma.hbm_to_vmem [thread:$0]  %s61_s8, 768, %s63_s12, [#allocation8], %s639_s9, %s639_s9, %s640_s10  }
   0x9   :  { %s642_s18 = smov [#allocation2]   ;;  %s643_s5 = smov [#allocation6]  }
   0xa   :  { %s21_s19 = sshll.u32 %s642_s18, 4  ;;  %s52_s20 = sshll.u32 %s643_s5, 4  ;;  %s22_s19 = int_to_ptr.vmem [resolvable:$true] %s21_s19  ;;  %s53_s20 = int_to_ptr.vmem [resolvable:$true] %s52_s20 }
   0xb   :  { %27 = dma.hbm_to_vmem [thread:$0]  %s20_s15, 512, %s22_s19, [#allocation3], %s639_s9, %s639_s9, %s640_s10  }
   0xc   :  { %s73_s23 = sshll.u32 %s811_s6, 4  ;;  %s644_s0 = smov [#allocation9]   ;;  %s74_s23 = int_to_ptr.hbm [resolvable:$true] %s73_s23 }
   0xd   :  { %55 = dma.hbm_to_vmem [thread:$0]  %s51_s17, 128, %s53_s20, [#allocation5]  }
   0xe   :  { %s75_s24 = sshll.u32 %s644_s0, 4  ;;  %s76_s24 = int_to_ptr.vmem [resolvable:$true] %s75_s24 }
   0xf   :  { %81 = dma.hbm_to_vmem [thread:$0]  %s74_s23, 256, %s76_s24, [#allocation8], %s639_s9, %s639_s9, %s640_s10  }
  0x10   :  { %632 = dma.done.wait [#allocation3], 512  }
  0x11   :  { %633 = vsyncadd [#allocation3], 4294966784 }
  0x12   :  { %634 = dma.done.wait [#allocation5], 896  }
  0x13   :  { %635 = vsyncadd [#allocation5], 4294966400 }
  0x14   :  { %636 = dma.done.wait [#allocation8], 1024  }
  0x15   :  { %637 = vsyncadd [#allocation8], 4294966272  ;;  %v123_v0 = vld [vmem:[%s807_s2 + $0x20] sm:$0xff]  ;;  %v122_v1 = vld [vmem:[%s807_s2 + $0x18] sm:$0xff]  ;;  %vm125_vm0 = vcmask 326656   ;;  %vm208_vm2 = vcmask 392192  }
  0x16   :  { %149 = vmatpush.msra.mxu0 %v123_v0  ;;  %v121_v2 = vld [vmem:[%s807_s2 + $0x10] sm:$0xff]  ;;  %v120_v3 = vld [vmem:[%s807_s2 + $0x8] sm:$0xff]  ;;  %v119_v4 = vld [vmem:[%s807_s2] sm:$0xff]  ;;  %s645_s2 = smov 120   ;;  %vm298_vm6 = vcmask 64512  }
  0x17   :  { %v102_v5 = vld [vmem:[#allocation2] sm:$0xff]  ;;  %v103_v6 = vld [vmem:[#allocation2 + $0x8] sm:$0xff]  ;;  %v104_v7 = vld [vmem:[#allocation2 + $0x10] sm:$0xff] }
  0x18   :  { %150 = vmatpush.msra.mxu0 %v122_v1  ;;  %v105_v8 = vld [vmem:[#allocation2 + $0x18] sm:$0xff]  ;;  %v206_v9 = vld [vmem:[#allocation4 + $0x28] sm:$0xff]  ;;  %v205_v10 = vld [vmem:[#allocation4 + $0x20] sm:$0xff] }
  0x19   :  { %231 = vmatpush.msra.mxu1 %v206_v9  ;;  %v204_v11 = vld [vmem:[#allocation4 + $0x18] sm:$0xff]  ;;  %v203_v12 = vld [vmem:[#allocation4 + $0x10] sm:$0xff]  ;;  %v202_v13 = vld [vmem:[#allocation4 + $0x8] sm:$0xff] }
  0x1a   :  { %151 = vmatpush.msra.mxu0 %v121_v2  ;;  %v201_v14 = vld [vmem:[#allocation4] sm:$0xff]  ;;  %v480_v15 = vld [vmem:[#allocation9] ss:$0 sm:$0xff]  ;;  %v717_v25 = vld [vmem:[#allocation9 + $0x1] ss:$0 sm:$0xff] }
  0x1b   :  { %232 = vmatpush.msra.mxu1 %v205_v10  ;;  %v719_v27 = vld [vmem:[#allocation9 + $0x2] ss:$0 sm:$0xff]  ;;  %v483_v54 = vld [vmem:[#allocation9 + $0x6] ss:$0 sm:$0xff] }
  0x1c   :  { %152 = vmatpush.msra.mxu0 %v120_v3 }
  0x1d   :  { %233 = vmatpush.msra.mxu1 %v204_v11  ;;  %v296_v11 = vld [vmem:[#allocation6] sm:$0xff] }
  0x1e   :  { %153 = vmatpush.msra.mxu0 %v119_v4  ;;  %326 = vmatpush.msra.mxu2 %v296_v11 }
  0x1f   :  { %447 = vmatmul.msk.f32.vlgmr.msra.gmra.mxu0 %vm125_vm0, %v102_v5  ;;  %234 = vmatpush.msra.mxu1 %v203_v12  ;;  %v106_v12 = vld [vmem:[%s806_s1] sm:$0xff] }
  0x21   :  { %235 = vmatpush.msra.mxu1 %v202_v13 }
  0x23   :  { %236 = vmatpush.msra.mxu1 %v201_v14  ;;  %v484_v14 = vld [vmem:[#allocation9 + $0x3] ss:$0 sm:$0xff] }
  0x27   :  { %448 = vmatmul.msk.f32.gmra.mxu0 %vm125_vm0, %v103_v6 }
  0x2f   :  { %449 = vmatmul.msk.f32.gmra.mxu0 %vm125_vm0, %v104_v7 }
  0x37   :  { %450 = vmatmul.msk.f32.gmra.mxu0 %vm125_vm0, %v105_v8 }
  0x9c   :  { %v155_v16 = vpop.f32.mrf.mxu0 }
  0x9d   :  { %v156_v17 = vadd.f32 %v480_v15, %v155_v16 }
  0x9f   :  { %v171_v18 = vmin.f32 %v156_v17, 0.0  ;;  %vm167_vm1 = vcmp.gt.f32.partialorder %v156_v17, 0.0 }
  0xa1   :  { %v175_v19 = vmul.f32 1.442695, %v171_v18 }
  0xa3   :  { %488 = vpow2.f32 %v175_v19  ;;  %v107_v19 = vld [vmem:[%s806_s1 + $0x8] sm:$0xff] }
  0xa4   :  { %v158_v20 = vpop.f32.mrf.mxu0 }
  0xa5   :  { %v159_v21 = vadd.f32 %v480_v15, %v158_v20 }
  0xa7   :  { %v172_v22 = vmin.f32 %v159_v21, 0.0  ;;  %vm168_vm3 = vcmp.gt.f32.partialorder %v159_v21, 0.0 }
  0xa9   :  { %v489_v23 = vpop.eup %488  ;;  %v177_v24 = vmul.f32 1.442695, %v172_v22 }
  0xaa   :  { %v451_v26 = vadd.f32 -1.0, %v489_v23 }
  0xab   :  { %490 = vpow2.f32 %v177_v24 }
  0xac   :  { %v187_v28 = vsel %vm167_vm1, %v156_v17, %v451_v26  ;;  %v161_v29 = vpop.f32.mrf.mxu0  ;;  %v485_v17 = vld [vmem:[#allocation9 + $0x4] ss:$0 sm:$0xff]  ;;  %v108_v26 = vld [vmem:[%s806_s1 + $0x10] sm:$0xff] }
  0xad   :  { %v162_v30 = vadd.f32 %v480_v15, %v161_v29  ;;  %v192_v31 = vmul.f32 %v717_v25, %v187_v28 }
  0xaf   :  { %v173_v32 = vmin.f32 %v162_v30, 0.0  ;;  %v197_v33 = vadd.f32 %v719_v27, %v192_v31  ;;  %vm169_vm4 = vcmp.gt.f32.partialorder %v162_v30, 0.0 }
  0xb1   :  { %v491_v34 = vpop.eup %490  ;;  %v179_v35 = vmul.f32 1.442695, %v173_v32  ;;  %455 = vmatmul.msk.f32.vlgmr.msra.gmra.mxu1 %vm208_vm2, %v197_v33  ;;  %v109_v33 = vld [vmem:[%s806_s1 + $0x18] sm:$0xff] }
  0xb2   :  { %v452_v36 = vadd.f32 -1.0, %v491_v34 }
  0xb3   :  { %492 = vpow2.f32 %v179_v35 }
  0xb4   :  { %v188_v37 = vsel %vm168_vm3, %v159_v21, %v452_v36  ;;  %v164_v38 = vpop.f32.mrf.mxu0 }
  0xb5   :  { %v165_v39 = vadd.f32 %v480_v15, %v164_v38  ;;  %v193_v40 = vmul.f32 %v717_v25, %v188_v37 }
  0xb7   :  { %v174_v41 = vmin.f32 %v165_v39, 0.0  ;;  %v198_v42 = vadd.f32 %v719_v27, %v193_v40  ;;  %vm170_vm5 = vcmp.gt.f32.partialorder %v165_v39, 0.0  ;;  %v377_v40 = vld [vmem:[#allocation7 + $0x28] sm:$0xff] }
  0xb8   :  { %401 = vmatpush.msra.mxu3 %v377_v40 }
  0xb9   :  { %v493_v43 = vpop.eup %492  ;;  %v181_v44 = vmul.f32 1.442695, %v174_v41  ;;  %456 = vmatmul.msk.f32.gmra.mxu1 %vm208_vm2, %v198_v42  ;;  %v376_v41 = vld [vmem:[#allocation7 + $0x20] sm:$0xff]  ;;  %v375_v42 = vld [vmem:[#allocation7 + $0x18] sm:$0xff] }
  0xba   :  { %v453_v45 = vadd.f32 -1.0, %v493_v43  ;;  %402 = vmatpush.msra.mxu3 %v376_v41  ;;  %v374_v43 = vld [vmem:[#allocation7 + $0x10] sm:$0xff] }
  0xbb   :  { %494 = vpow2.f32 %v181_v44  ;;  %v373_v44 = vld [vmem:[#allocation7 + $0x8] sm:$0xff] }
  0xbc   :  { %v189_v46 = vsel %vm169_vm4, %v162_v30, %v453_v45  ;;  %403 = vmatpush.msra.mxu3 %v375_v42  ;;  %v372_v45 = vld [vmem:[#allocation7] sm:$0xff] }
  0xbd   :  { %v194_v47 = vmul.f32 %v717_v25, %v189_v46  ;;  %v486_v46 = vld [vmem:[#allocation9 + $0x5] ss:$0 sm:$0xff] }
  0xbe   :  { %404 = vmatpush.msra.mxu3 %v374_v43 }
  0xbf   :  { %v199_v48 = vadd.f32 %v719_v27, %v194_v47 }
  0xc0   :  { %405 = vmatpush.msra.mxu3 %v373_v44 }
  0xc1   :  { %v495_v49 = vpop.eup %494  ;;  %457 = vmatmul.msk.f32.gmra.mxu1 %vm208_vm2, %v199_v48 }
  0xc2   :  { %v454_v50 = vadd.f32 -1.0, %v495_v49  ;;  %406 = vmatpush.msra.mxu3 %v372_v45 }
  0xc4   :  { %v190_v51 = vsel %vm170_vm5, %v165_v39, %v454_v50 }
  0xc5   :  { %v195_v52 = vmul.f32 %v717_v25, %v190_v51 }
  0xc7   :  { %v200_v53 = vadd.f32 %v719_v27, %v195_v52 }
  0xc9   :  { %458 = vmatmul.msk.f32.gmra.mxu1 %vm208_vm2, %v200_v53 }
 0x12e   :  { %v238_v55 = vpop.f32.mrf.mxu1 }
 0x12f   :  { %v733_v56 = vadd.f32 %v483_v54, %v238_v55 }
 0x131   :  { %v250_v57 = vmul.f32 0.5, %v733_v56 }
 0x133   :  { %v254_v58 = vmul.f32 1.442695, %v250_v57 }
 0x135   :  { %496 = vpow2.f32 %v254_v58 }
 0x136   :  { %v241_v59 = vpop.f32.mrf.mxu1 }
 0x137   :  { %v736_v60 = vadd.f32 %v483_v54, %v241_v59 }
 0x139   :  { %v251_v61 = vmul.f32 0.5, %v736_v60 }
 0x13b   :  { %v497_v62 = vpop.eup %496  ;;  %v256_v63 = vmul.f32 1.442695, %v251_v61 }
 0x13c   :  { %266 = vrot.lane.b32.xlu0 %v497_v62, %s645_s2 }
 0x13d   :  { %498 = vpow2.f32 %v256_v63 }
 0x13e   :  { %v244_v0 = vpop.f32.mrf.mxu1 }
 0x13f   :  { %v739_v1 = vadd.f32 %v483_v54, %v244_v0 }
 0x141   :  { %v252_v2 = vmul.f32 0.5, %v739_v1 }
 0x143   :  { %v499_v3 = vpop.eup %498  ;;  %v258_v4 = vmul.f32 1.442695, %v252_v2 }
 0x144   :  { %268 = vrot.lane.b32.xlu0 %v499_v3, %s645_s2 }
 0x145   :  { %500 = vpow2.f32 %v258_v4 }
 0x146   :  { %v247_v5 = vpop.f32.mrf.mxu1 }
 0x147   :  { %v742_v6 = vadd.f32 %v483_v54, %v247_v5 }
 0x149   :  { %v253_v7 = vmul.f32 0.5, %v742_v6 }
 0x14b   :  { %v501_v8 = vpop.eup %500  ;;  %v260_v9 = vmul.f32 1.442695, %v253_v7 }
 0x14c   :  { %270 = vrot.lane.b32.xlu1 %v501_v8, %s645_s2 }
 0x14d   :  { %502 = vpow2.f32 %v260_v9 }
 0x153   :  { %v503_v10 = vpop.eup %502 }
 0x154   :  { %272 = vrot.lane.b32.xlu1 %v503_v10, %s645_s2 }
 0x1ae   :  { %v267_v13 = vpop.permute.xlu0 %266 }
 0x1af   :  { %v278_v15 = vmul.f32 %v267_v13, %v106_v12 }
 0x1b1   :  { %v282_v16 = vadd.f32 %v278_v15, %v733_v56 }
 0x1b3   :  { %v287_v18 = vmul.f32 %v484_v14, %v282_v16 }
 0x1b5   :  { %v292_v20 = vadd.f32 %v485_v17, %v287_v18 }
 0x1b6   :  { %v269_v21 = vpop.permute.xlu0 %268 }
 0x1b7   :  { %v279_v22 = vmul.f32 %v269_v21, %v107_v19  ;;  %459 = vmatmul.msk.f32.vlgmr.msra.gmra.mxu2 %vm298_vm6, %v292_v20 }
 0x1b9   :  { %v283_v23 = vadd.f32 %v279_v22, %v736_v60 }
 0x1bb   :  { %v288_v24 = vmul.f32 %v484_v14, %v283_v23  ;;  %v118_v23 = vld [vmem:[#allocation9 + $0x8] sm:$0x1] }
 0x1bc   :  { %vm420_vm11 = vcmp.gt.f32.partialorder %v118_v23, 0.5 }
 0x1bd   :  { %v293_v28 = vadd.f32 %v485_v17, %v288_v24  ;;  %v646_v24 = vmov 0  }
 0x1be   :  { %v271_v29 = vpop.permute.xlu1 %270 }
 0x1bf   :  { %v280_v30 = vmul.f32 %v271_v29, %v108_v26  ;;  %460 = vmatmul.msk.f32.gmra.mxu2 %vm298_vm6, %v293_v28  ;;  %v425_v26 = vsel %vm420_vm11, 1, %v646_v24  ;;  %v487_v28 = vld [vmem:[#allocation9 + $0x7] ss:$0 sm:$0xff] }
 0x1c0   :  { %v426_v29 = vperm.slane %v425_v26, 0 }
 0x1c1   :  { %v284_v31 = vadd.f32 %v280_v30, %v739_v1 }
 0x1c2   :  { %vm777_vm12 = vcmp.eq.s32.totalorder %v426_v29, 1 }
 0x1c3   :  { %v289_v32 = vmul.f32 %v484_v14, %v284_v31 }
 0x1c5   :  { %v294_v34 = vadd.f32 %v485_v17, %v289_v32 }
 0x1c6   :  { %v273_v35 = vpop.permute.xlu1 %272 }
 0x1c7   :  { %v281_v36 = vmul.f32 %v273_v35, %v109_v33  ;;  %461 = vmatmul.msk.f32.gmra.mxu2 %vm298_vm6, %v294_v34 }
 0x1c9   :  { %v285_v37 = vadd.f32 %v281_v36, %v742_v6 }
 0x1cb   :  { %v290_v38 = vmul.f32 %v484_v14, %v285_v37 }
 0x1cd   :  { %v295_v39 = vadd.f32 %v485_v17, %v290_v38 }
 0x1cf   :  { %462 = vmatmul.msk.f32.gmra.mxu2 %vm298_vm6, %v295_v39 }
 0x23a   :  { %v328_v47 = vpop.f32.mrf.mxu2 }
 0x23b   :  { %v329_v48 = vadd.f32 %v486_v46, %v328_v47 }
 0x23d   :  { %v344_v49 = vmin.f32 %v329_v48, 0.0  ;;  %vm340_vm7 = vcmp.gt.f32.partialorder %v329_v48, 0.0 }
 0x23f   :  { %v348_v50 = vmul.f32 1.442695, %v344_v49 }
 0x241   :  { %504 = vpow2.f32 %v348_v50 }
 0x242   :  { %v331_v51 = vpop.f32.mrf.mxu2 }
 0x243   :  { %v332_v52 = vadd.f32 %v486_v46, %v331_v51 }
 0x245   :  { %v345_v53 = vmin.f32 %v332_v52, 0.0  ;;  %vm341_vm8 = vcmp.gt.f32.partialorder %v332_v52, 0.0 }
 0x247   :  { %v505_v54 = vpop.eup %504  ;;  %v350_v55 = vmul.f32 1.442695, %v345_v53 }
 0x248   :  { %v463_v57 = vadd.f32 -1.0, %v505_v54 }
 0x249   :  { %506 = vpow2.f32 %v350_v55 }
 0x24a   :  { %v360_v58 = vsel %vm340_vm7, %v329_v48, %v463_v57  ;;  %v334_v59 = vpop.f32.mrf.mxu2 }
 0x24b   :  { %v335_v61 = vadd.f32 %v486_v46, %v334_v59  ;;  %v364_v62 = vmul.f32 %v717_v25, %v360_v58 }
 0x24d   :  { %v346_v63 = vmin.f32 %v335_v61, 0.0  ;;  %v368_v0 = vadd.f32 %v719_v27, %v364_v62  ;;  %vm342_vm9 = vcmp.gt.f32.partialorder %v335_v61, 0.0 }
 0x24f   :  { %v507_v2 = vpop.eup %506  ;;  %v352_v3 = vmul.f32 1.442695, %v346_v63  ;;  %467 = vmatmul.msk.f32.vlgmr.msra.gmra.mxu3 %vm208_vm2, %v368_v0 }
 0x250   :  { %v464_v4 = vadd.f32 -1.0, %v507_v2 }
 0x251   :  { %508 = vpow2.f32 %v352_v3 }
 0x252   :  { %v361_v5 = vsel %vm341_vm8, %v332_v52, %v464_v4  ;;  %v337_v7 = vpop.f32.mrf.mxu2 }
 0x253   :  { %v338_v8 = vadd.f32 %v486_v46, %v337_v7  ;;  %v365_v9 = vmul.f32 %v717_v25, %v361_v5 }
 0x255   :  { %v347_v10 = vmin.f32 %v338_v8, 0.0  ;;  %v369_v11 = vadd.f32 %v719_v27, %v365_v9  ;;  %vm343_vm10 = vcmp.gt.f32.partialorder %v338_v8, 0.0 }
 0x257   :  { %v509_v12 = vpop.eup %508  ;;  %v354_v13 = vmul.f32 1.442695, %v347_v10  ;;  %468 = vmatmul.msk.f32.gmra.mxu3 %vm208_vm2, %v369_v11 }
 0x258   :  { %v465_v14 = vadd.f32 -1.0, %v509_v12 }
 0x259   :  { %510 = vpow2.f32 %v354_v13 }
 0x25a   :  { %v362_v15 = vsel %vm342_vm9, %v335_v61, %v465_v14 }
 0x25b   :  { %v366_v16 = vmul.f32 %v717_v25, %v362_v15 }
 0x25d   :  { %v370_v17 = vadd.f32 %v719_v27, %v366_v16 }
 0x25f   :  { %v511_v18 = vpop.eup %510  ;;  %469 = vmatmul.msk.f32.gmra.mxu3 %vm208_vm2, %v370_v17 }
 0x260   :  { %v466_v19 = vadd.f32 -1.0, %v511_v18 }
 0x262   :  { %v363_v20 = vsel %vm343_vm10, %v338_v8, %v466_v19 }
 0x263   :  { %v367_v21 = vmul.f32 %v717_v25, %v363_v20 }
 0x265   :  { %v371_v22 = vadd.f32 %v719_v27, %v367_v21 }
 0x267   :  { %470 = vmatmul.msk.f32.gmra.mxu3 %vm208_vm2, %v371_v22 }
 0x2d2   :  { %v408_v30 = vpop.f32.mrf.mxu3 }
 0x2d3   :  { %v409_v31 = vadd.f32 %v487_v28, %v408_v30 }
 0x2d5   :  { %v421_v33 = vmax.f32 %v409_v31, 0.0 }
 0x2d7   :  { %v428_v25 = vsel %vm777_vm12, %v421_v33, %v409_v31 }
 0x2d8   :  { %v432_v27 = vadd.f32 %v428_v25, %v733_v56 }
 0x2da   :  { %436 = vst [vmem:[%s812_s7] sm:$0xff] %v432_v27  ;;  %v411_v34 = vpop.f32.mrf.mxu3 }
 0x2db   :  { %v412_v35 = vadd.f32 %v487_v28, %v411_v34 }
 0x2dd   :  { %v422_v36 = vmax.f32 %v412_v35, 0.0 }
 0x2df   :  { %v429_v37 = vsel %vm777_vm12, %v422_v36, %v412_v35 }
 0x2e0   :  { %v433_v38 = vadd.f32 %v429_v37, %v736_v60 }
 0x2e2   :  { %437 = vst [vmem:[%s812_s7 + $0x8] sm:$0xff] %v433_v38  ;;  %v414_v39 = vpop.f32.mrf.mxu3 }
 0x2e3   :  { %v415_v40 = vadd.f32 %v487_v28, %v414_v39 }
 0x2e5   :  { %v423_v41 = vmax.f32 %v415_v40, 0.0 }
 0x2e7   :  { %v430_v56 = vsel %vm777_vm12, %v423_v41, %v415_v40 }
 0x2e8   :  { %v434_v42 = vadd.f32 %v430_v56, %v739_v1 }
 0x2ea   :  { %438 = vst [vmem:[%s812_s7 + $0x10] sm:$0xff] %v434_v42  ;;  %v417_v43 = vpop.f32.mrf.mxu3 }
 0x2eb   :  { %v418_v44 = vadd.f32 %v487_v28, %v417_v43 }
 0x2ed   :  { %v424_v45 = vmax.f32 %v418_v44, 0.0 }
 0x2ef   :  { %v431_v60 = vsel %vm777_vm12, %v424_v45, %v418_v44 }
 0x2f0   :  { %v435_v46 = vadd.f32 %v431_v60, %v742_v6 }
 0x2f2   :  { %439 = vst [vmem:[%s812_s7 + $0x18] sm:$0xff] %v435_v46 }
 0x2f3   :  { %444 = vsyncpa [#allocation3], 1 }
 0x2f4   :  { %445 = vsyncpa [#allocation5], 1 }
 0x2f5   :  { %446 = vsyncpa [#allocation8], 1 }

</bundles_post_ra>
